<compile_context>
chip_gen: v6e
topology: v6e:2x2x1
jax: 0.10.0
libtpu: 0.0.40
codegen_flags: <defaults>
</compile_context>

<pallas_src>
import jax
import jax.numpy as jnp
from jax.experimental import pallas as pl
from jax.experimental.pallas import tpu as pltpu

LANE = 128
ROW = 64            # batch items per 128-lane row ([B,2] row-major -> lane pairs)
SUBLANE = 8
MAX_TILE_R = 2048   # 2048*128*4B = 1 MiB per block; ~4 MiB double-buffered in+out


def _round_up(a, m):
    return ((a + m - 1) // m) * m


def d_kernel(p_ref, x_ref, o_ref):
    # p_ref: SMEM f32[6] = [w00, w01, w10, w11, b0, b1]  (folded affine, [in, out])
    # x_ref, o_ref: VMEM f32[tile_r, 128]; lanes interleave (x0, x1) per batch item:
    #   even lane -> feature 0, odd lane -> feature 1 (row-major [B, 2] layout).
    x = x_ref[...]

    w00 = p_ref[0]
    w01 = p_ref[1]
    w10 = p_ref[2]
    w11 = p_ref[3]
    b0 = p_ref[4]
    b1 = p_ref[5]

    li = jax.lax.broadcasted_iota(jnp.int32, x.shape, 1)   # lane index
    even = (li & 1) == 0
    pair = li ^ 1                                          # lane of the pair partner

    # Pair-partner gather via two XLU lane rotations (shift 1 and 127 == -1 mod 128).
    # Selecting by the rotated iota's source lane makes this independent of the
    # rotation direction convention and correct at the 0/127 lane boundaries
    # (the wrapped lanes are never the selected source for their parity).
    x_r1 = pltpu.roll(x, shift=1, axis=1)
    x_r127 = pltpu.roll(x, shift=127, axis=1)
    src_r1 = pltpu.roll(li, shift=1, axis=1)
    partner = jnp.where(src_r1 == pair, x_r1, x_r127)

    # Lane-alternating folded weights / bias (VPU selects on SMEM scalars):
    #   even lanes: y0 = x0*w00 + x1*w10 + b0
    #   odd  lanes: y1 = x0*w01 + x1*w11 + b1
    w_self = jnp.where(even, w00, w11)
    w_other = jnp.where(even, w10, w01)
    b_lane = jnp.where(even, b0, b1)

    # Pure VPU FMAs; sigmoid goes to the EUP.  Full-width unmasked store.
    o_ref[...] = jax.nn.sigmoid(x * w_self + partner * w_other + b_lane)


def d_forward(x, w_a, b_a, w_b, b_b):
    """Forward of module D.

    x:   [B, 2] float32
    w_a: [2, 2] (PyTorch layout [out, in]) of D.b.a.l1 ; b_a: [2]
    w_b: [2, 2] (PyTorch layout [out, in]) of D.b.l1   ; b_b: [2]
    """
    B, feat = x.shape
    assert feat == 2

    # Fold the two affine layers (forward-equivalent; checkpoint is backward-only).
    #   y = (x @ Wa^T + ba) @ Wb^T + bb = x @ (Wa^T @ Wb^T) + (ba @ Wb^T + bb)
    # TODO(synk): if a backward pass is added, route grads back through the fold
    # to the individual (w_a, b_a, w_b, b_b) parameters.
    w_fold = w_a.T @ w_b.T                      # [in, out] = [2, 2]
    b_fold = b_a @ w_b.T + b_b                  # [2]
    params = jnp.concatenate(
        [w_fold.reshape(-1), b_fold.reshape(-1)]
    ).astype(jnp.float32)                       # [w00, w01, w10, w11, b0, b1]

    # Row-major zero-copy reshape [B, 2] -> [r, 128] (interleaved feature pairs).
    # Pad only to a multiple of 64 (plus a 512 floor so tiny inputs still give
    # standard (8,128) tiles); when B is already aligned this path is copy-free.
    b_pad = max(_round_up(B, ROW), ROW * SUBLANE)
    xf = x.astype(jnp.float32)
    if b_pad != B:
        xf = jnp.pad(xf, ((0, b_pad - B), (0, 0)))
    r = b_pad // ROW
    x_rows = xf.reshape(r, 2 * ROW)             # [r, 128]

    # Tile selection: >=2 grid steps for moderate r (v7x megacore), 1 MiB cap,
    # partial edge blocks instead of power-of-two padding.
    if r <= SUBLANE:
        tile_r = r
    else:
        tile_r = min(MAX_TILE_R, _round_up(pl.cdiv(r, 2), SUBLANE))
    grid = (pl.cdiv(r, tile_r),)

    out = pl.pallas_call(
        d_kernel,
        out_shape=jax.ShapeDtypeStruct((r, 2 * ROW), jnp.float32),
        grid=grid,
        in_specs=[
            pl.BlockSpec(memory_space=pltpu.MemorySpace.SMEM),       # 6 folded scalars
            pl.BlockSpec((tile_r, 2 * ROW), lambda i: (i, 0)),       # x tile (lane-dense)
            # If DMA is still exposed on some chip, sweep pipeline_mode=pl.Buffered(3).
        ],
        out_specs=pl.BlockSpec((tile_r, 2 * ROW), lambda i: (i, 0)),
        compiler_params=pltpu.CompilerParams(
            dimension_semantics=("parallel",),
        ),
    )(params, x_rows)

    # Zero-copy reshape back; the [:B] slice only copies when padding was needed.
    y = out.reshape(b_pad, 2)[:B]
    return y.astype(x.dtype)


def init_params(key):
    """PyTorch Linear default init: uniform(-k, k), k = 1/sqrt(in_features)."""
    in_f, out_f = 2, 2
    bound = 1.0 / jnp.sqrt(jnp.float32(in_f))
    key, ka_w, ka_b, kb_w, kb_b = jax.random.split(key, 5)
    w_a = jax.random.uniform(ka_w, (out_f, in_f), jnp.float32, -bound, bound)
    b_a = jax.random.uniform(ka_b, (out_f,), jnp.float32, -bound, bound)
    w_b = jax.random.uniform(kb_w, (out_f, in_f), jnp.float32, -bound, bound)
    b_b = jax.random.uniform(kb_b, (out_f,), jnp.float32, -bound, bound)
    return w_a, b_a, w_b, b_b


def d_reference(x, w_a, b_a, w_b, b_b):
    """Plain-JAX reference: sigmoid(lB(lA(x))) with un-folded layers."""
    y = x @ w_a.T + b_a
    y = y @ w_b.T + b_b
    return jax.nn.sigmoid(y)


if __name__ == "__main__":
    key = jax.random.PRNGKey(0)
    key, kx, kp = jax.random.split(key, 3)

    batch, feat = 8, 2
    x = jax.random.normal(kx, (batch, feat), jnp.float32)
    w_a, b_a, w_b, b_b = init_params(kp)

    out = d_forward(x, w_a, b_a, w_b, b_b)
    out = jax.block_until_ready(out)

    ref = d_reference(x, w_a, b_a, w_b, b_b)
    assert out.shape == (batch, feat)
    assert jnp.allclose(out, ref, atol=1e-5, rtol=1e-5)

    # Extra coverage: multi-block grid (B=1000) and a partial edge tile (B=600).
    for bsz in (1000, 600):
        xb = jax.random.normal(jax.random.fold_in(kx, bsz), (bsz, feat), jnp.float32)
        ob = jax.block_until_ready(d_forward(xb, w_a, b_a, w_b, b_b))
        rb = d_reference(xb, w_a, b_a, w_b, b_b)
        assert ob.shape == (bsz, feat)
        assert jnp.allclose(ob, rb, atol=1e-5, rtol=1e-5)

    print("KERNEL_OK")
</pallas_src>

<mosaic_0001>
module attributes {stable_mosaic.version = 11 : i64} {
  func.func @d_kernel(%arg0: i32, %arg1: memref<6xf32, #tpu.memory_space<smem>>, %arg2: memref<8x128xf32, #tpu.memory_space<vmem>>, %arg3: memref<8x128xf32, #tpu.memory_space<vmem>>) attributes {dimension_semantics = [#tpu.dimension_semantics<parallel>], iteration_bounds = array<i64: 1>, scalar_prefetch = 0 : i64, scratch_operands = 0 : i64, tpu.core_type = #tpu.core_type<tc>, window_params = [{transform_indices = @transform_0, window_bounds = array<i64: 6>}, {transform_indices = @transform_1, window_bounds = array<i64: 8, 128>}, {transform_indices = @transform_2, window_bounds = array<i64: 8, 128>}]} {
    %c0 = arith.constant 0 : index
    %c0_0 = arith.constant 0 : index
    %0 = vector.load %arg2[%c0, %c0_0] : memref<8x128xf32, #tpu.memory_space<vmem>>, vector<8x128xf32>
    %c0_1 = arith.constant 0 : index
    %1 = memref.load %arg1[%c0_1] : memref<6xf32, #tpu.memory_space<smem>>
    %c1 = arith.constant 1 : index
    %2 = memref.load %arg1[%c1] : memref<6xf32, #tpu.memory_space<smem>>
    %c2 = arith.constant 2 : index
    %3 = memref.load %arg1[%c2] : memref<6xf32, #tpu.memory_space<smem>>
    %c3 = arith.constant 3 : index
    %4 = memref.load %arg1[%c3] : memref<6xf32, #tpu.memory_space<smem>>
    %c4 = arith.constant 4 : index
    %5 = memref.load %arg1[%c4] : memref<6xf32, #tpu.memory_space<smem>>
    %c5 = arith.constant 5 : index
    %6 = memref.load %arg1[%c5] : memref<6xf32, #tpu.memory_space<smem>>
    %7 = tpu.iota {dimensions = array<i32: 1>} : vector<8x128xi32>
    %c1_i32 = arith.constant 1 : i32
    %8 = vector.broadcast %c1_i32 : i32 to vector<8x128xi32>
    %9 = arith.andi %7, %8 : vector<8x128xi32>
    %c0_i32 = arith.constant 0 : i32
    %10 = vector.broadcast %c0_i32 : i32 to vector<8x128xi32>
    %11 = arith.cmpi eq, %9, %10 : vector<8x128xi32>
    %c1_i32_2 = arith.constant 1 : i32
    %12 = vector.broadcast %c1_i32_2 : i32 to vector<8x128xi32>
    %13 = arith.xori %7, %12 : vector<8x128xi32>
    %c1_i32_3 = arith.constant 1 : i32
    %14 = tpu.dynamic_rotate %0 by %c1_i32_3 dim 1 : vector<8x128xf32>, i32 -> vector<8x128xf32>
    %c127_i32 = arith.constant 127 : i32
    %15 = tpu.dynamic_rotate %0 by %c127_i32 dim 1 : vector<8x128xf32>, i32 -> vector<8x128xf32>
    %c1_i32_4 = arith.constant 1 : i32
    %16 = tpu.dynamic_rotate %7 by %c1_i32_4 dim 1 : vector<8x128xi32>, i32 -> vector<8x128xi32>
    %17 = arith.cmpi eq, %16, %13 : vector<8x128xi32>
    %18 = arith.select %17, %14, %15 : vector<8x128xi1>, vector<8x128xf32>
    %19 = vector.broadcast %1 : f32 to vector<8x128xf32>
    %20 = vector.broadcast %4 : f32 to vector<8x128xf32>
    %21 = arith.select %11, %19, %20 : vector<8x128xi1>, vector<8x128xf32>
    %22 = vector.broadcast %3 : f32 to vector<8x128xf32>
    %23 = vector.broadcast %2 : f32 to vector<8x128xf32>
    %24 = arith.select %11, %22, %23 : vector<8x128xi1>, vector<8x128xf32>
    %25 = vector.broadcast %5 : f32 to vector<8x128xf32>
    %26 = vector.broadcast %6 : f32 to vector<8x128xf32>
    %27 = arith.select %11, %25, %26 : vector<8x128xi1>, vector<8x128xf32>
    %28 = arith.mulf %0, %21 : vector<8x128xf32>
    %29 = arith.mulf %18, %24 : vector<8x128xf32>
    %30 = arith.addf %28, %29 : vector<8x128xf32>
    %31 = arith.addf %30, %27 : vector<8x128xf32>
    %32 = arith.negf %31 : vector<8x128xf32>
    %33 = math.exp %32 : vector<8x128xf32>
    %cst = arith.constant 1.000000e+00 : f32
    %34 = vector.broadcast %cst : f32 to vector<8x128xf32>
    %35 = arith.addf %34, %33 : vector<8x128xf32>
    %36 = arith.divf %34, %35 : vector<8x128xf32>
    %c0_5 = arith.constant 0 : index
    %c0_6 = arith.constant 0 : index
    %37 = vector.load %arg3[%c0_5, %c0_6] : memref<8x128xf32, #tpu.memory_space<vmem>>, vector<8x128xf32>
    tpu.vector_store %arg3[%c0_5, %c0_6], %36 {strides = array<i32>} : memref<8x128xf32, #tpu.memory_space<vmem>>, vector<8x128xf32>,
    return
  }
  func.func @transform_0(%arg0: i32) -> i32 {
    %c0_i32 = arith.constant 0 : i32
    %c0_i32_0 = arith.constant 0 : i32
    return %c0_i32 : i32
  }
  func.func @transform_1(%arg0: i32) -> (i32, i32) {
    %c0_i32 = arith.constant 0 : i32
    %c0_i32_0 = arith.constant 0 : i32
    return %arg0, %c0_i32 : i32, i32
  }
  func.func @transform_2(%arg0: i32) -> (i32, i32) {
    %c0_i32 = arith.constant 0 : i32
    %c0_i32_0 = arith.constant 0 : i32
    return %arg0, %c0_i32 : i32, i32
  }
}

</mosaic_0001>

<bundles_post_ra>
// kernel: tpu_custom_call.1
= control target key start
LH: loop header
LB: loop body
LE: loop exit
PB: predicated region body
PF: predicated region fallthrough
CT: control target
= control target key end

     0   :  { %7 = vsyncpa [#allocation5], 0  ;;  %s199_s0 = inlined_call_operand.hbm [shape: f32[6], index: 0, kind: input, shape index: {}]   ;;  %s200_s1 = inlined_call_operand.hbm [shape: f32[8,128], index: 1, kind: input, shape index: {}]   ;;  %s201_s2 = inlined_call_operand.hbm [shape: f32[8,128], index: 2, kind: output, shape index: {}]  }
   0x1   :  { %8 = vsyncpa [#allocation3], 0 }
   0x2   :  { %9 = vsyncpa [#allocation4], 0  ;;  %s160_s9 = smov [#allocation2]   ;;  %s161_s12 = smov [#allocation6]  }
   0x3   :  { %17 = dma.hbm_to_smem %s199_s0, 16, %s160_s9, [#allocation5]  }
   0x4   :  { %s24_s13 = sshll.u32 %s161_s12, 4  ;;  %s25_s13 = int_to_ptr.vmem [resolvable:$true] %s24_s13 }
   0x5   :  { %s122_s14 = scalar_lea.vmem %s25_s13, 128  ;;  %p127_p1 = scmp.lt.s32.totalorder %s25_s13, %s25_s13 }
   0x6   :  { %p123_p0 = scmp.ne.s32.totalorder %s25_s13, %s122_s14  ;;  %p128_p2 = scmp.lt.s32.totalorder %s122_s14, %s122_s14 }
   0x8   :  { %p129_p3 = por %p128_p2, %p127_p1 }
   0xa   :  { %p130_p4 = pnand %p129_p3, %p123_p0 }
   0xc   :  { %133 = shalt.err (!%p130_p4)
}
   0xd   :  { %27 = dma.hbm_to_vmem [thread:$0]  %s200_s1, 128, %s25_s13, [#allocation3]  }
   0xe   :  { %154 = dma.done.wait [#allocation5], 16  }
   0xf   :  { %155 = vsyncadd [#allocation5], 4294967280 }
  0x10   :  { %156 = dma.done.wait [#allocation3], 128  }
  0x11   :  { %157 = vsyncadd [#allocation3], 4294967168 }
  0x12   :  { %34 = sfence }
  0x13   :  { %v42_v0 = vlaneseq  ;;  %v35_v1 = vld [vmem:[#allocation6] sm:$0xff]  ;;  %s36_s0 = sld [smem:[#allocation2]]  ;;  %s162_s18 = smov 127  }
  0x14   :  { %s93_s17 = sld [smem:[#allocation2 + $0x3]]  ;;  %49 = vrot.lane.b32.xlu1 %v35_v1, %s162_s18  ;;  %s163_s19 = smov 1  }
  0x15   :  { %v43_v2 = vand.u32 127, %v42_v0  ;;  %s91_s1 = sld [smem:[#allocation2 + $0x1]]  ;;  %s164_s23 = smov [#allocation7]  }
  0x16   :  { %s92_s20 = sld [smem:[#allocation2 + $0x2]]  ;;  %s81_s24 = sshll.u32 %s164_s23, 4  ;;  %s82_s24 = int_to_ptr.vmem [resolvable:$true] %s81_s24 }
  0x17   :  { %51 = vrot.lane.b32.xlu0 %v43_v2, %s163_s19  ;;  %v44_v3 = vand.u32 1, %v43_v2  ;;  %s94_s21 = sld [smem:[#allocation2 + $0x4]]  ;;  %v46_v10 = vxor.u32 1, %v43_v2  ;;  %s134_s25 = scalar_lea.vmem %s82_s24, 128 }
  0x18   :  { %s95_s22 = sld [smem:[#allocation2 + $0x5]]  ;;  %p135_p5 = scmp.ne.s32.totalorder %s82_s24, %s134_s25 }
  0x19   :  { %vm186_vm0 = vcmp.eq.s32.totalorder %v44_v3, 0  ;;  %v55_v5 = vstv %s36_s0  ;;  %p139_p6 = scmp.lt.s32.totalorder %s82_s24, %s82_s24  ;;  %p140_p7 = scmp.lt.s32.totalorder %s134_s25, %s134_s25 }
  0x1a   :  { %v56_v6 = vstv %s93_s17 }
  0x1b   :  { %v57_v7 = vsel %vm186_vm0, %v55_v5, %v56_v6  ;;  %47 = vrot.lane.b32.xlu0 %v35_v1, %s163_s19  ;;  %v59_v12 = vstv %s91_s1  ;;  %p141_p8 = por %p140_p7, %p139_p6 }
  0x1c   :  { %v64_v8 = vmul.f32 %v57_v7, %v35_v1  ;;  %v58_v11 = vstv %s92_s20 }
  0x1d   :  { %v60_v14 = vsel %vm186_vm0, %v58_v11, %v59_v12  ;;  %v61_v15 = vstv %s94_s21  ;;  %p142_p9 = pnand %p141_p8, %p135_p5 }
  0x1e   :  { %v62_v16 = vstv %s95_s22 }
  0x1f   :  { %v63_v20 = vsel %vm186_vm0, %v61_v15, %v62_v16 }
  0x86   :  { %v50_v13 = vpop.permute.xlu1 %49 }
  0x89   :  { %v52_v9 = vpop.permute.xlu0 %51 }
  0x8a   :  { %vm53_vm1 = vcmp.eq.s32.totalorder %v52_v9, %v46_v10 }
  0x8d   :  { %v48_v17 = vpop.permute.xlu0 %47 }
  0x8e   :  { %v54_v18 = vsel %vm53_vm1, %v48_v17, %v50_v13 }
  0x8f   :  { %v65_v19 = vmul.f32 %v60_v14, %v54_v18 }
  0x91   :  { %v66_v21 = vadd.f32 %v65_v19, %v64_v8 }
  0x93   :  { %v67_v22 = vadd.f32 %v66_v21, %v63_v20 }
  0x95   :  { %v96_v23 = vmul.f32 -1.442695, %v67_v22 }
  0x97   :  { %102 = vpow2.f32 %v96_v23 }
  0xa4   :  { %v103_v24 = vpop.eup %102 }
  0xa5   :  { %v71_v25 = vadd.f32 1.0, %v103_v24 }
  0xa7   :  { %104 = vrcp.f32 %v71_v25 }
  0xb4   :  { %v105_v26 = vpop.eup %104 }
  0xb5   :  { %74 = vst [vmem:[#allocation7] sm:$0xff] %v105_v26 }
  0xb6   :  { %145 = shalt.err (!%p142_p9)
}
  0xb7   :  { %84 = dma.vmem_to_hbm [thread:$0]  %s82_s24, 128, %s201_s2, [#allocation4]  }
  0xb8   :  { %158 = dma.done.wait [#allocation4], 128  }
  0xb9   :  { %159 = vsyncadd [#allocation4], 4294967168 }
  0xba   :  { %88 = vsyncpa [#allocation3], 1 }
  0xbb   :  { %89 = vsyncpa [#allocation4], 1 }
  0xbc   :  { %90 = vsyncpa [#allocation5], 1 }

</bundles_post_ra>
